<compile_context>
chip_gen: v6e
topology: v6e:2x2x1
jax: 0.10.0
libtpu: 0.0.40
codegen_flags: <defaults>
</compile_context>

<pallas_src>
import functools

import jax
import jax.numpy as jnp
from jax.experimental import pallas as pl
from jax.experimental.pallas import tpu as pltpu


_LANE = 128
_SMALL_PATH_WEIGHT_BYTES = 4 * 1024 * 1024  # all-views weight resident in VMEM below this


def _round_up(x, m):
    return ((x + m - 1) // m) * m


def _vmem_capacity_bytes():
    try:
        return int(pltpu.get_tpu_info().vmem_capacity_bytes)
    except Exception:
        return 64 << 20  # conservative fallback = v7x per-core VMEM


def _pick_lane_tile(k_rows, itemsize, weight_budget_bytes):
    """Lane tile (multiple of 128) so a DOUBLE-buffered (k_rows, tn) weight block
    fits in weight_budget_bytes.  Floors at 128 (minimum lane tile); the actual
    vmem_limit_bytes is derived from the real footprint, so the floor can never
    silently exceed the scoped limit."""
    max_tn = (weight_budget_bytes // (2 * itemsize * k_rows)) // _LANE * _LANE
    tn = max(_LANE, max_tn)
    return min(tn, _round_up(k_rows, _LANE))  # never bigger than the (padded) K


# ----------------------------- kernels --------------------------------------


def _agg_tiled_kernel(a_ref, w_ref, o_ref):
    # One MXU matmul per (view, lane-tile) grid point.  The combined weight
    # already contains the identity (self) term and the neighborhood scaling.
    o_ref[...] = jnp.dot(
        a_ref[...], w_ref[...], preferred_element_type=jnp.float32
    ).astype(o_ref.dtype)


def _agg_tiled_kernel_q(a_ref, w_ref, s_ref, o_ref, *, x_self, tn):
    # int8 neighborhood weight, dequantized via a per-output-column scale in the
    # epilogue; the exact self term x_self * a is added from the resident A block.
    a = a_ref[...]
    w = w_ref[...].astype(jnp.float32).astype(a.dtype)
    acc = jnp.dot(a, w, preferred_element_type=jnp.float32) * s_ref[...]
    col0 = pl.multiple_of(pl.program_id(1) * tn, _LANE)
    acc = acc + x_self * a_ref[:, pl.ds(col0, tn)].astype(jnp.float32)
    o_ref[...] = acc.astype(o_ref.dtype)


def _agg_small_kernel(a_ref, w_ref, o_ref):
    # Single grid point: every view's folded weight is resident in VMEM; unroll
    # the (small, static) view loop so there is no grid/pipeline overhead.
    for v in range(a_ref.shape[0]):
        o_ref[v] = jnp.dot(
            a_ref[v], w_ref[v], preferred_element_type=jnp.float32
        ).astype(o_ref.dtype)


def _agg_small_kernel_q(a_ref, w_ref, s_ref, o_ref, *, x_self):
    for v in range(a_ref.shape[0]):
        a = a_ref[v]
        w = w_ref[v].astype(jnp.float32).astype(a.dtype)
        acc = jnp.dot(a, w, preferred_element_type=jnp.float32) * s_ref[v]
        acc = acc + x_self * a.astype(jnp.float32)
        o_ref[v] = acc.astype(o_ref.dtype)


# --------------------------- weight preparation ------------------------------


def fold_weights(all_weights, num_views, num_neiborhood):
    """W'_i = w_self*I + w_neib*sum_j W_{i,j}, folded in f32."""
    K = all_weights.shape[-1]
    y = 1.0 / (2.0 + num_neiborhood)
    x = 2.0 * y
    w = all_weights.astype(jnp.float32).reshape(num_views, num_neiborhood, K, K)
    eye = jnp.eye(K, dtype=jnp.float32)
    return x * eye[None] + y * jnp.sum(w, axis=1)  # (V, K, K) f32


def prepare_aggregation_weights(
    all_weights,
    num_views,
    num_neiborhood,
    *,
    compute_dtype=jnp.bfloat16,
    weight_dtype=None,
    weight_block_budget_bytes=None,
    small_path_weight_bytes=None,
):
    """Fold, cast/quantize and lay out the per-view weights ONCE (model init).

    all_weights: (num_views * num_neiborhood, K, K), nn.ModuleList order.
    compute_dtype: activation/matmul dtype (bf16 default; fold stays in f32).
    weight_dtype: None (= compute_dtype) or jnp.int8 for a quantized weight
        stream (per-output-column scales; the self term is added exactly in
        the kernel epilogue).
    weight_block_budget_bytes: override for the double-buffered weight-tile
        VMEM budget (default = physical VMEM / 4).
    small_path_weight_bytes: override of the "everything fits in VMEM" path
        threshold (mainly for testing).
    """
    V, K = num_views, all_weights.shape[-1]
    y_neib = 1.0 / (2.0 + num_neiborhood)
    x_self = 2.0 * y_neib
    vmem_cap = _vmem_capacity_bytes()

    use_int8 = weight_dtype is not None and jnp.dtype(weight_dtype) == jnp.dtype(jnp.int8)
    if use_int8:
        # Quantize only the neighborhood part; the identity/self term is applied
        # exactly in the epilogue so the big diagonal does not dominate the
        # per-column quantization range.
        w_neib = y_neib * jnp.sum(
            all_weights.astype(jnp.float32).reshape(V, num_neiborhood, K, K), axis=1
        )
        absmax = jnp.max(jnp.abs(w_neib), axis=1, keepdims=True)          # (V, 1, K)
        scales = (jnp.maximum(absmax, 1e-12) / 127.0).astype(jnp.float32)
        w_store = jnp.clip(jnp.round(w_neib / scales), -127, 127).astype(jnp.int8)
    else:
        w_store = fold_weights(all_weights, V, num_neiborhood).astype(compute_dtype)
        scales = None
    w_item = jnp.dtype(w_store.dtype).itemsize

    prepared = dict(
        V=V, K=K, compute_dtype=compute_dtype, x_self=float(x_self), vmem_cap=vmem_cap
    )

    # ---- small path: all views' weights resident in VMEM, single grid point.
    if small_path_weight_bytes is None:
        small_path_weight_bytes = _SMALL_PATH_WEIGHT_BYTES
    small_thresh = min(small_path_weight_bytes, vmem_cap // 8)
    if V * K * K * w_item <= small_thresh:
        prepared.update(small=True, w=w_store, scales=scales, tn=K, nt=1, K_pad=K)
        return prepared

    # ---- tiled path: lane-tile the weight's output axis.
    if weight_block_budget_bytes is None:
        weight_block_budget_bytes = max(vmem_cap // 4, 8 << 20)
    K_r = _round_up(K, _LANE)
    tn = _pick_lane_tile(K_r, w_item, weight_block_budget_bytes)
    nt = pl.cdiv(K, tn)
    K_pad = nt * tn

    # Pad to (K_pad, K_pad) (handles K not a multiple of 128, e.g. 80x60=4800),
    # then go tile-major so each (K_pad, tn) weight block is one contiguous HBM
    # region (big DMA bursts instead of tn-wide strided rows).
    w_pad = jnp.pad(w_store, ((0, 0), (0, K_pad - K), (0, K_pad - K)))
    w_tiles = w_pad.reshape(V, K_pad, nt, tn).transpose(0, 2, 1, 3)      # (V, nt, K_pad, tn)
    s_tiles = None
    if scales is not None:
        s_pad = jnp.pad(scales, ((0, 0), (0, 0), (0, K_pad - K)))
        s_tiles = s_pad.reshape(V, 1, nt, tn).transpose(0, 2, 1, 3)      # (V, nt, 1, tn)

    prepared.update(small=False, w=w_tiles, scales=s_tiles, tn=tn, nt=nt, K_pad=K_pad)
    return prepared


# ------------------------------- forward -------------------------------------


def _aggregation_small(a, prepared, out_dtype):
    V, M, K = a.shape
    out_shape = jax.ShapeDtypeStruct((V, M, K), out_dtype)
    if prepared["scales"] is None:
        return pl.pallas_call(_agg_small_kernel, out_shape=out_shape)(a, prepared["w"])
    kernel = functools.partial(_agg_small_kernel_q, x_self=prepared["x_self"])
    return pl.pallas_call(kernel, out_shape=out_shape)(a, prepared["w"], prepared["scales"])


def _aggregation_tiled(a, prepared, out_dtype):
    V, M, K = a.shape
    tn, nt, K_pad = prepared["tn"], prepared["nt"], prepared["K_pad"]
    w, s = prepared["w"], prepared["scales"]
    if K_pad != K:
        a = jnp.pad(a, ((0, 0), (0, 0), (0, K_pad - K)))

    w_item = jnp.dtype(w.dtype).itemsize
    a_item = jnp.dtype(a.dtype).itemsize
    o_item = jnp.dtype(out_dtype).itemsize
    need = (2 * K_pad * tn * w_item       # double-buffered weight tile (dominant)
            + 2 * M * K_pad * a_item      # A block (conservatively x2)
            + 2 * M * tn * o_item)        # double-buffered output tile
    if s is not None:
        need += 2 * tn * 4
    vmem_limit = int(min(prepared["vmem_cap"], max(32 << 20, need + (4 << 20))))

    in_specs = [
        pl.BlockSpec((None, M, K_pad), lambda v, n: (v, 0, 0)),
        # Tile-major weight: block (K_pad, tn) is a contiguous HBM region.
        pl.BlockSpec((None, None, K_pad, tn), lambda v, n: (v, n, 0, 0)),
    ]
    if s is None:
        kernel = _agg_tiled_kernel
        args = (a, w)
    else:
        in_specs.append(pl.BlockSpec((None, None, 1, tn), lambda v, n: (v, n, 0, 0)))
        kernel = functools.partial(_agg_tiled_kernel_q, x_self=prepared["x_self"], tn=tn)
        args = (a, w, s)

    out = pl.pallas_call(
        kernel,
        out_shape=jax.ShapeDtypeStruct((V, M, K_pad), out_dtype),
        grid_spec=pltpu.PrefetchScalarGridSpec(
            num_scalar_prefetch=0,
            grid=(V, nt),
            in_specs=in_specs,
            out_specs=pl.BlockSpec((None, M, tn), lambda v, n: (v, 0, n)),
        ),
        compiler_params=pltpu.CompilerParams(
            # No reduction axis remains; both axes are independent.  The view
            # axis lets v7x's two TensorCores split the work.
            dimension_semantics=("parallel", "parallel"),
            vmem_limit_bytes=vmem_limit,
        ),
    )(*args)
    return out[:, :, :K] if K_pad != K else out


def aggregation_forward(inputs, prepared):
    """inputs: list of (N, C, H, W) arrays (one per view).
    prepared: result of prepare_aggregation_weights (computed once, reused).
    Returns: list of (N, C, H, W) arrays (same dtype as the inputs)."""
    V = prepared["V"]
    assert len(inputs) == V
    N, C, H, W = inputs[0].shape
    M, K = N * C, H * W
    assert K == prepared["K"]
    out_dtype = inputs[0].dtype

    a = jnp.stack([x.reshape(M, K) for x in inputs], axis=0)
    a = a.astype(prepared["compute_dtype"])                 # (V, M, K)

    if prepared["small"]:
        out = _aggregation_small(a, prepared, out_dtype)    # (V, M, K)
    else:
        out = _aggregation_tiled(a, prepared, out_dtype)    # (V, M, K)
    return [out[i].reshape(N, C, H, W) for i in range(V)]


# --------------------------------- test ---------------------------------------


if __name__ == "__main__":
    CAMNUM = 4
    NUM_NEIBORHOOD = 2   # pairs = [[0,1,3],[1,0,2],[2,1,3],[3,0,2]]
    NUM_NETS = CAMNUM * NUM_NEIBORHOOD
    N, C = 2, 4

    def make_case(key, heatmap):
        H, W = heatmap
        K = H * W
        kw, ki = jax.random.split(key)
        all_w = jax.random.uniform(kw, (NUM_NETS, K, K), jnp.float32, 0.0, 0.1)
        iks = jax.random.split(ki, CAMNUM)
        inputs = [jax.random.normal(iks[i], (N, C, H, W), jnp.float32)
                  for i in range(CAMNUM)]
        return all_w, inputs

    def reference(all_w, inputs, heatmap):
        # Pure-JAX reference of the original (unfolded) PyTorch forward.
        H, W = heatmap
        K = H * W
        y_w = 1.0 / (2.0 + NUM_NEIBORHOOD)
        x_w = 2.0 * y_w
        refs, idx = [], 0
        for i in range(CAMNUM):
            a = inputs[i].reshape(N * C, K)
            r = x_w * inputs[i]
            for _ in range(NUM_NEIBORHOOD):
                fc = jnp.dot(a, all_w[idx], preferred_element_type=jnp.float32)
                r = r + y_w * fc.reshape(N, C, H, W)
                idx += 1
            refs.append(r)
        return refs

    def check(outs, refs, rtol, atol):
        good = True
        for o, r in zip(outs, refs):
            good = good and bool(jnp.allclose(o, r, rtol=rtol, atol=atol))
        return good

    k1, k2 = jax.random.split(jax.random.PRNGKey(0))
    ok = True

    # Case A: production-like 16x16 heatmap (K=256) -> small single-grid-point path.
    hm_a = (16, 16)
    w_a, in_a = make_case(k1, hm_a)
    ref_a = reference(w_a, in_a, hm_a)

    prep = prepare_aggregation_weights(w_a, CAMNUM, NUM_NEIBORHOOD,
                                       compute_dtype=jnp.float32)
    out = [jax.block_until_ready(o) for o in aggregation_forward(in_a, prep)]
    ok = ok and check(out, ref_a, 1e-3, 1e-3)

    prep = prepare_aggregation_weights(w_a, CAMNUM, NUM_NEIBORHOOD)   # bf16 default
    out = [jax.block_until_ready(o) for o in aggregation_forward(in_a, prep)]
    ok = ok and check(out, ref_a, 3e-2, 3e-2)

    prep = prepare_aggregation_weights(w_a, CAMNUM, NUM_NEIBORHOOD,
                                       weight_dtype=jnp.int8)
    out = [jax.block_until_ready(o) for o in aggregation_forward(in_a, prep)]
    ok = ok and check(out, ref_a, 5e-2, 5e-2)

    # Case B: 40x20 heatmap (K=800, not a multiple of 128) -> tiled path with
    # padded lane axis; a small block budget forces multiple lane tiles.
    hm_b = (40, 20)
    w_b, in_b = make_case(k2, hm_b)
    ref_b = reference(w_b, in_b, hm_b)

    prep = prepare_aggregation_weights(w_b, CAMNUM, NUM_NEIBORHOOD,
                                       weight_block_budget_bytes=256 * 1024)
    out = [jax.block_until_ready(o) for o in aggregation_forward(in_b, prep)]
    ok = ok and check(out, ref_b, 3e-2, 3e-2)

    prep = prepare_aggregation_weights(w_b, CAMNUM, NUM_NEIBORHOOD,
                                       weight_dtype=jnp.int8,
                                       weight_block_budget_bytes=256 * 1024,
                                       small_path_weight_bytes=0)
    out = [jax.block_until_ready(o) for o in aggregation_forward(in_b, prep)]
    ok = ok and check(out, ref_b, 5e-2, 5e-2)

    if ok:
        print("KERNEL_OK")
    else:
        raise SystemExit("mismatch vs reference")
</pallas_src>

<mosaic_0001>
module attributes {stable_mosaic.version = 11 : i64} {
  func.func @_agg_small_kernel(%arg0: memref<4x8x256xf32, #tpu.memory_space<vmem>>, %arg1: memref<4x256x256xf32, #tpu.memory_space<vmem>>, %arg2: memref<4x8x256xf32, #tpu.memory_space<vmem>>) attributes {dimension_semantics = [], scalar_prefetch = 0 : i64, scratch_operands = 0 : i64, tpu.core_type = #tpu.core_type<tc>} {
    %c0 = arith.constant 0 : index
    %c0_0 = arith.constant 0 : index
    %c0_1 = arith.constant 0 : index
    %0 = vector.load %arg0[%c0, %c0_0, %c0_1] : memref<4x8x256xf32, #tpu.memory_space<vmem>>, vector<1x8x256xf32>
    %1 = vector.shape_cast %0 : vector<1x8x256xf32> to vector<8x256xf32>
    %c0_2 = arith.constant 0 : index
    %c0_3 = arith.constant 0 : index
    %c0_4 = arith.constant 0 : index
    %2 = vector.load %arg1[%c0_2, %c0_3, %c0_4] : memref<4x256x256xf32, #tpu.memory_space<vmem>>, vector<1x256x256xf32>
    %3 = vector.shape_cast %2 : vector<1x256x256xf32> to vector<256x256xf32>
    %cst = arith.constant dense<0.000000e+00> : vector<8x256xf32>
    %4 = tpu.matmul %1, %3, %cst {dimension_numbers = #tpu.dot_dimension_numbers<[1], [0], [0], [1], [0, 0, 1, 1], [], []>} : vector<8x256xf32>, vector<256x256xf32>, vector<8x256xf32> -> vector<8x256xf32>
    %c0_5 = arith.constant 0 : index
    %c0_6 = arith.constant 0 : index
    %c0_7 = arith.constant 0 : index
    %5 = vector.load %arg2[%c0_5, %c0_6, %c0_7] : memref<4x8x256xf32, #tpu.memory_space<vmem>>, vector<1x8x256xf32>
    %6 = vector.shape_cast %5 : vector<1x8x256xf32> to vector<8x256xf32>
    %7 = vector.shape_cast %4 : vector<8x256xf32> to vector<1x8x256xf32>
    tpu.vector_store %arg2[%c0_5, %c0_6, %c0_7], %7 {strides = array<i32>} : memref<4x8x256xf32, #tpu.memory_space<vmem>>, vector<1x8x256xf32>,
    %c1 = arith.constant 1 : index
    %c0_8 = arith.constant 0 : index
    %c0_9 = arith.constant 0 : index
    %8 = vector.load %arg0[%c1, %c0_8, %c0_9] : memref<4x8x256xf32, #tpu.memory_space<vmem>>, vector<1x8x256xf32>
    %9 = vector.shape_cast %8 : vector<1x8x256xf32> to vector<8x256xf32>
    %c1_10 = arith.constant 1 : index
    %c0_11 = arith.constant 0 : index
    %c0_12 = arith.constant 0 : index
    %10 = vector.load %arg1[%c1_10, %c0_11, %c0_12] : memref<4x256x256xf32, #tpu.memory_space<vmem>>, vector<1x256x256xf32>
    %11 = vector.shape_cast %10 : vector<1x256x256xf32> to vector<256x256xf32>
    %cst_13 = arith.constant dense<0.000000e+00> : vector<8x256xf32>
    %12 = tpu.matmul %9, %11, %cst_13 {dimension_numbers = #tpu.dot_dimension_numbers<[1], [0], [0], [1], [0, 0, 1, 1], [], []>} : vector<8x256xf32>, vector<256x256xf32>, vector<8x256xf32> -> vector<8x256xf32>
    %c1_14 = arith.constant 1 : index
    %c0_15 = arith.constant 0 : index
    %c0_16 = arith.constant 0 : index
    %13 = vector.load %arg2[%c1_14, %c0_15, %c0_16] : memref<4x8x256xf32, #tpu.memory_space<vmem>>, vector<1x8x256xf32>
    %14 = vector.shape_cast %13 : vector<1x8x256xf32> to vector<8x256xf32>
    %15 = vector.shape_cast %12 : vector<8x256xf32> to vector<1x8x256xf32>
    tpu.vector_store %arg2[%c1_14, %c0_15, %c0_16], %15 {strides = array<i32>} : memref<4x8x256xf32, #tpu.memory_space<vmem>>, vector<1x8x256xf32>,
    %c2 = arith.constant 2 : index
    %c0_17 = arith.constant 0 : index
    %c0_18 = arith.constant 0 : index
    %16 = vector.load %arg0[%c2, %c0_17, %c0_18] : memref<4x8x256xf32, #tpu.memory_space<vmem>>, vector<1x8x256xf32>
    %17 = vector.shape_cast %16 : vector<1x8x256xf32> to vector<8x256xf32>
    %c2_19 = arith.constant 2 : index
    %c0_20 = arith.constant 0 : index
    %c0_21 = arith.constant 0 : index
    %18 = vector.load %arg1[%c2_19, %c0_20, %c0_21] : memref<4x256x256xf32, #tpu.memory_space<vmem>>, vector<1x256x256xf32>
    %19 = vector.shape_cast %18 : vector<1x256x256xf32> to vector<256x256xf32>
    %cst_22 = arith.constant dense<0.000000e+00> : vector<8x256xf32>
    %20 = tpu.matmul %17, %19, %cst_22 {dimension_numbers = #tpu.dot_dimension_numbers<[1], [0], [0], [1], [0, 0, 1, 1], [], []>} : vector<8x256xf32>, vector<256x256xf32>, vector<8x256xf32> -> vector<8x256xf32>
    %c2_23 = arith.constant 2 : index
    %c0_24 = arith.constant 0 : index
    %c0_25 = arith.constant 0 : index
    %21 = vector.load %arg2[%c2_23, %c0_24, %c0_25] : memref<4x8x256xf32, #tpu.memory_space<vmem>>, vector<1x8x256xf32>
    %22 = vector.shape_cast %21 : vector<1x8x256xf32> to vector<8x256xf32>
    %23 = vector.shape_cast %20 : vector<8x256xf32> to vector<1x8x256xf32>
    tpu.vector_store %arg2[%c2_23, %c0_24, %c0_25], %23 {strides = array<i32>} : memref<4x8x256xf32, #tpu.memory_space<vmem>>, vector<1x8x256xf32>,
    %c3 = arith.constant 3 : index
    %c0_26 = arith.constant 0 : index
    %c0_27 = arith.constant 0 : index
    %24 = vector.load %arg0[%c3, %c0_26, %c0_27] : memref<4x8x256xf32, #tpu.memory_space<vmem>>, vector<1x8x256xf32>
    %25 = vector.shape_cast %24 : vector<1x8x256xf32> to vector<8x256xf32>
    %c3_28 = arith.constant 3 : index
    %c0_29 = arith.constant 0 : index
    %c0_30 = arith.constant 0 : index
    %26 = vector.load %arg1[%c3_28, %c0_29, %c0_30] : memref<4x256x256xf32, #tpu.memory_space<vmem>>, vector<1x256x256xf32>
    %27 = vector.shape_cast %26 : vector<1x256x256xf32> to vector<256x256xf32>
    %cst_31 = arith.constant dense<0.000000e+00> : vector<8x256xf32>
    %28 = tpu.matmul %25, %27, %cst_31 {dimension_numbers = #tpu.dot_dimension_numbers<[1], [0], [0], [1], [0, 0, 1, 1], [], []>} : vector<8x256xf32>, vector<256x256xf32>, vector<8x256xf32> -> vector<8x256xf32>
    %c3_32 = arith.constant 3 : index
    %c0_33 = arith.constant 0 : index
    %c0_34 = arith.constant 0 : index
    %29 = vector.load %arg2[%c3_32, %c0_33, %c0_34] : memref<4x8x256xf32, #tpu.memory_space<vmem>>, vector<1x8x256xf32>
    %30 = vector.shape_cast %29 : vector<1x8x256xf32> to vector<8x256xf32>
    %31 = vector.shape_cast %28 : vector<8x256xf32> to vector<1x8x256xf32>
    tpu.vector_store %arg2[%c3_32, %c0_33, %c0_34], %31 {strides = array<i32>} : memref<4x8x256xf32, #tpu.memory_space<vmem>>, vector<1x8x256xf32>,
    return
  }
}

</mosaic_0001>

<bundles_post_ra>
// kernel: tpu_custom_call.1
= control target key start
LH: loop header
LB: loop body
LE: loop exit
PB: predicated region body
PF: predicated region fallthrough
CT: control target
= control target key end

     0   :  { %7 = vsyncpa [#allocation3], 0  ;;  %s732_s0 = inlined_call_operand.hbm [shape: f32[4,8,256], index: 0, kind: input, shape index: {}]   ;;  %s733_s1 = inlined_call_operand.hbm [shape: f32[4,256,256], index: 1, kind: input, shape index: {}]   ;;  %s734_s2 = inlined_call_operand.hbm [shape: f32[4,8,256], index: 2, kind: output, shape index: {}]  }
   0x1   :  { %8 = vsyncpa [#allocation6], 0 }
   0x2   :  { %9 = vsyncpa [#allocation4], 0  ;;  %s694_s9 = smov [#allocation2]  }
   0x3   :  { %s15_s10 = sshll.u32 %s694_s9, 4  ;;  %s16_s10 = int_to_ptr.vmem [resolvable:$true] %s15_s10 }
   0x4   :  { %s636_s11 = scalar_lea.vmem %s16_s10, 1024  ;;  %p641_p1 = scmp.lt.s32.totalorder %s16_s10, %s16_s10 }
   0x5   :  { %p637_p0 = scmp.ne.s32.totalorder %s16_s10, %s636_s11  ;;  %p642_p2 = scmp.lt.s32.totalorder %s636_s11, %s636_s11 }
   0x7   :  { %p643_p3 = por %p642_p2, %p641_p1 }
   0x9   :  { %p644_p4 = pnand %p643_p3, %p637_p0 }
   0xb   :  { %647 = shalt.err (!%p644_p4)
}
   0xc   :  { %s695_s12 = smov 256   ;;  %s696_s13 = smov 16  }
   0xd   :  { %21 = dma.hbm_to_vmem [thread:$0]  %s732_s0, 1024, %s16_s10, [#allocation3], %s695_s12, %s695_s12, %s696_s13  }
   0xe   :  { %s697_s16 = smov [#allocation5]  }
   0xf   :  { %s27_s17 = sshll.u32 %s697_s16, 4  ;;  %s28_s17 = int_to_ptr.vmem [resolvable:$true] %s27_s17 }
  0x10   :  { %s656_s18 = scalar_lea.vmem %s28_s17, 32768  ;;  %p661_p6 = scmp.lt.s32.totalorder %s28_s17, %s28_s17 }
  0x11   :  { %p657_p5 = scmp.ne.s32.totalorder %s28_s17, %s656_s18  ;;  %p662_p7 = scmp.lt.s32.totalorder %s656_s18, %s656_s18 }
  0x13   :  { %p663_p8 = por %p662_p7, %p661_p6 }
  0x15   :  { %p664_p9 = pnand %p663_p8, %p657_p5 }
  0x17   :  { %667 = shalt.err (!%p664_p9)
}
  0x18   :  { %33 = dma.hbm_to_vmem [thread:$0]  %s733_s1, 32768, %s28_s17, [#allocation6], %s695_s12, %s695_s12, %s696_s13  }
  0x19   :  { %688 = dma.done.wait [#allocation3], 1024  }
  0x1a   :  { %689 = vsyncadd [#allocation3], 4294966272 }
  0x1b   :  { %690 = dma.done.wait [#allocation6], 32768  }
  0x1c   :  { %691 = vsyncadd [#allocation6], 4294934528  ;;  %v73_v0 = vld [vmem:[#allocation5 + $0xf8] sm:$0xff]  ;;  %v72_v2 = vld [vmem:[#allocation5 + $0xf0] sm:$0xff]  ;;  %s698_s0 = smov [#allocation7]  }
  0x1d   :  { %v214_v1 = vld [vmem:[#allocation5 + $0x2f8] sm:$0xff]  ;;  %106 = vmatprep.subr.mxu0 %v73_v0  ;;  %v213_v3 = vld [vmem:[#allocation5 + $0x2f0] sm:$0xff]  ;;  %v71_v4 = vld [vmem:[#allocation5 + $0xe8] sm:$0xff]  ;;  %s610_s1 = sshll.u32 %s698_s0, 4  ;;  %s611_s1 = int_to_ptr.vmem [resolvable:$true] %s610_s1 }
  0x1e   :  { %247 = vmatprep.subr.mxu1 %v214_v1  ;;  %v212_v5 = vld [vmem:[#allocation5 + $0x2e8] sm:$0xff]  ;;  %107 = vmatpush1.msra.mxu0 %v72_v2  ;;  %v70_v6 = vld [vmem:[#allocation5 + $0xe0] sm:$0xff]  ;;  %v69_v8 = vld [vmem:[#allocation5 + $0xd8] sm:$0xff]  ;;  %s668_s21 = scalar_lea.vmem %s611_s1, 1024  ;;  %p673_p11 = scmp.lt.s32.totalorder %s611_s1, %s611_s1 }
  0x1f   :  { %248 = vmatpush1.msra.mxu1 %v213_v3  ;;  %v211_v7 = vld [vmem:[#allocation5 + $0x2e0] sm:$0xff]  ;;  %108 = vmatprep.subr.mxu0 %v71_v4  ;;  %v210_v9 = vld [vmem:[#allocation5 + $0x2d8] sm:$0xff]  ;;  %v68_v10 = vld [vmem:[#allocation5 + $0xd0] sm:$0xff]  ;;  %p669_p10 = scmp.ne.s32.totalorder %s611_s1, %s668_s21  ;;  %p674_p12 = scmp.lt.s32.totalorder %s668_s21, %s668_s21 }
  0x20   :  { %249 = vmatprep.subr.mxu1 %v212_v5  ;;  %v209_v11 = vld [vmem:[#allocation5 + $0x2d0] sm:$0xff]  ;;  %109 = vmatpush1.msra.mxu0 %v70_v6  ;;  %v67_v12 = vld [vmem:[#allocation5 + $0xc8] sm:$0xff]  ;;  %v66_v14 = vld [vmem:[#allocation5 + $0xc0] sm:$0xff] }
  0x21   :  { %250 = vmatpush1.msra.mxu1 %v211_v7  ;;  %v208_v13 = vld [vmem:[#allocation5 + $0x2c8] sm:$0xff]  ;;  %110 = vmatprep.subr.mxu0 %v69_v8  ;;  %v207_v15 = vld [vmem:[#allocation5 + $0x2c0] sm:$0xff]  ;;  %v65_v16 = vld [vmem:[#allocation5 + $0xb8] sm:$0xff]  ;;  %p675_p13 = por %p674_p12, %p673_p11 }
  0x22   :  { %251 = vmatprep.subr.mxu1 %v210_v9  ;;  %111 = vmatpush1.msra.mxu0 %v68_v10  ;;  %v206_v17 = vld [vmem:[#allocation5 + $0x2b8] sm:$0xff]  ;;  %v64_v18 = vld [vmem:[#allocation5 + $0xb0] sm:$0xff]  ;;  %v63_v20 = vld [vmem:[#allocation5 + $0xa8] sm:$0xff] }
  0x23   :  { %252 = vmatpush1.msra.mxu1 %v209_v11  ;;  %112 = vmatprep.subr.mxu0 %v67_v12  ;;  %v205_v19 = vld [vmem:[#allocation5 + $0x2b0] sm:$0xff]  ;;  %v204_v21 = vld [vmem:[#allocation5 + $0x2a8] sm:$0xff]  ;;  %v62_v22 = vld [vmem:[#allocation5 + $0xa0] sm:$0xff]  ;;  %p676_p0 = pnand %p675_p13, %p669_p10 }
  0x24   :  { %253 = vmatprep.subr.mxu1 %v208_v13  ;;  %113 = vmatpush1.msra.mxu0 %v66_v14  ;;  %v203_v23 = vld [vmem:[#allocation5 + $0x2a0] sm:$0xff]  ;;  %v61_v24 = vld [vmem:[#allocation5 + $0x98] sm:$0xff]  ;;  %v60_v26 = vld [vmem:[#allocation5 + $0x90] sm:$0xff] }
  0x25   :  { %254 = vmatpush1.msra.mxu1 %v207_v15  ;;  %114 = vmatprep.subr.mxu0 %v65_v16  ;;  %v202_v25 = vld [vmem:[#allocation5 + $0x298] sm:$0xff]  ;;  %v201_v27 = vld [vmem:[#allocation5 + $0x290] sm:$0xff]  ;;  %v59_v28 = vld [vmem:[#allocation5 + $0x88] sm:$0xff] }
  0x26   :  { %255 = vmatprep.subr.mxu1 %v206_v17  ;;  %115 = vmatpush1.msra.mxu0 %v64_v18  ;;  %v200_v29 = vld [vmem:[#allocation5 + $0x288] sm:$0xff]  ;;  %v58_v30 = vld [vmem:[#allocation5 + $0x80] sm:$0xff]  ;;  %v57_v32 = vld [vmem:[#allocation5 + $0x78] sm:$0xff] }
  0x27   :  { %256 = vmatpush1.msra.mxu1 %v205_v19  ;;  %116 = vmatprep.subr.mxu0 %v63_v20  ;;  %v199_v31 = vld [vmem:[#allocation5 + $0x280] sm:$0xff]  ;;  %v198_v33 = vld [vmem:[#allocation5 + $0x278] sm:$0xff]  ;;  %v56_v34 = vld [vmem:[#allocation5 + $0x70] sm:$0xff] }
  0x28   :  { %257 = vmatprep.subr.mxu1 %v204_v21  ;;  %117 = vmatpush1.msra.mxu0 %v62_v22  ;;  %v197_v35 = vld [vmem:[#allocation5 + $0x270] sm:$0xff]  ;;  %v55_v36 = vld [vmem:[#allocation5 + $0x68] sm:$0xff]  ;;  %v54_v38 = vld [vmem:[#allocation5 + $0x60] sm:$0xff] }
  0x29   :  { %258 = vmatpush1.msra.mxu1 %v203_v23  ;;  %118 = vmatprep.subr.mxu0 %v61_v24  ;;  %v196_v37 = vld [vmem:[#allocation5 + $0x268] sm:$0xff]  ;;  %v195_v39 = vld [vmem:[#allocation5 + $0x260] sm:$0xff]  ;;  %v53_v40 = vld [vmem:[#allocation5 + $0x58] sm:$0xff] }
  0x2a   :  { %259 = vmatprep.subr.mxu1 %v202_v25  ;;  %119 = vmatpush1.msra.mxu0 %v60_v26  ;;  %v194_v41 = vld [vmem:[#allocation5 + $0x258] sm:$0xff]  ;;  %v52_v42 = vld [vmem:[#allocation5 + $0x50] sm:$0xff]  ;;  %v51_v44 = vld [vmem:[#allocation5 + $0x48] sm:$0xff] }
  0x2b   :  { %260 = vmatpush1.msra.mxu1 %v201_v27  ;;  %120 = vmatprep.subr.mxu0 %v59_v28  ;;  %v193_v43 = vld [vmem:[#allocation5 + $0x250] sm:$0xff]  ;;  %v192_v45 = vld [vmem:[#allocation5 + $0x248] sm:$0xff]  ;;  %v50_v46 = vld [vmem:[#allocation5 + $0x40] sm:$0xff] }
  0x2c   :  { %261 = vmatprep.subr.mxu1 %v200_v29  ;;  %121 = vmatpush1.msra.mxu0 %v58_v30  ;;  %v191_v47 = vld [vmem:[#allocation5 + $0x240] sm:$0xff]  ;;  %v49_v48 = vld [vmem:[#allocation5 + $0x38] sm:$0xff]  ;;  %v48_v50 = vld [vmem:[#allocation5 + $0x30] sm:$0xff] }
  0x2d   :  { %262 = vmatpush1.msra.mxu1 %v199_v31  ;;  %122 = vmatprep.subr.mxu0 %v57_v32  ;;  %v190_v49 = vld [vmem:[#allocation5 + $0x238] sm:$0xff]  ;;  %v189_v51 = vld [vmem:[#allocation5 + $0x230] sm:$0xff]  ;;  %v47_v52 = vld [vmem:[#allocation5 + $0x28] sm:$0xff] }
  0x2e   :  { %263 = vmatprep.subr.mxu1 %v198_v33  ;;  %123 = vmatpush1.msra.mxu0 %v56_v34  ;;  %v188_v53 = vld [vmem:[#allocation5 + $0x228] sm:$0xff]  ;;  %v46_v54 = vld [vmem:[#allocation5 + $0x20] sm:$0xff]  ;;  %v45_v56 = vld [vmem:[#allocation5 + $0x18] sm:$0xff] }
  0x2f   :  { %264 = vmatpush1.msra.mxu1 %v197_v35  ;;  %124 = vmatprep.subr.mxu0 %v55_v36  ;;  %v187_v55 = vld [vmem:[#allocation5 + $0x220] sm:$0xff]  ;;  %v186_v57 = vld [vmem:[#allocation5 + $0x218] sm:$0xff]  ;;  %v44_v58 = vld [vmem:[#allocation5 + $0x10] sm:$0xff] }
  0x30   :  { %265 = vmatprep.subr.mxu1 %v196_v37  ;;  %125 = vmatpush1.msra.mxu0 %v54_v38  ;;  %v185_v59 = vld [vmem:[#allocation5 + $0x210] sm:$0xff]  ;;  %v43_v60 = vld [vmem:[#allocation5 + $0x8] sm:$0xff]  ;;  %v42_v62 = vld [vmem:[#allocation5] sm:$0xff] }
  0x31   :  { %266 = vmatpush1.msra.mxu1 %v195_v39  ;;  %126 = vmatprep.subr.mxu0 %v53_v40  ;;  %v184_v61 = vld [vmem:[#allocation5 + $0x208] sm:$0xff]  ;;  %v183_v63 = vld [vmem:[#allocation5 + $0x200] sm:$0xff]  ;;  %v105_v0 = vld [vmem:[#allocation5 + $0x1f8] sm:$0xff] }
  0x32   :  { %267 = vmatprep.subr.mxu1 %v194_v41  ;;  %127 = vmatpush1.msra.mxu0 %v52_v42  ;;  %v246_v1 = vld [vmem:[#allocation5 + $0x3f8] sm:$0xff]  ;;  %v104_v2 = vld [vmem:[#allocation5 + $0x1f0] sm:$0xff]  ;;  %v103_v4 = vld [vmem:[#allocation5 + $0x1e8] sm:$0xff] }
  0x33   :  { %268 = vmatpush1.msra.mxu1 %v193_v43  ;;  %128 = vmatprep.subr.mxu0 %v51_v44  ;;  %v245_v3 = vld [vmem:[#allocation5 + $0x3f0] sm:$0xff]  ;;  %v244_v5 = vld [vmem:[#allocation5 + $0x3e8] sm:$0xff]  ;;  %v102_v6 = vld [vmem:[#allocation5 + $0x1e0] sm:$0xff] }
  0x34   :  { %269 = vmatprep.subr.mxu1 %v192_v45  ;;  %129 = vmatpush1.msra.mxu0 %v50_v46  ;;  %v243_v7 = vld [vmem:[#allocation5 + $0x3e0] sm:$0xff]  ;;  %v101_v8 = vld [vmem:[#allocation5 + $0x1d8] sm:$0xff]  ;;  %v100_v10 = vld [vmem:[#allocation5 + $0x1d0] sm:$0xff] }
  0x35   :  { %270 = vmatpush1.msra.mxu1 %v191_v47  ;;  %130 = vmatprep.subr.mxu0 %v49_v48  ;;  %v242_v9 = vld [vmem:[#allocation5 + $0x3d8] sm:$0xff]  ;;  %v241_v11 = vld [vmem:[#allocation5 + $0x3d0] sm:$0xff]  ;;  %v99_v12 = vld [vmem:[#allocation5 + $0x1c8] sm:$0xff] }
  0x36   :  { %271 = vmatprep.subr.mxu1 %v190_v49  ;;  %131 = vmatpush1.msra.mxu0 %v48_v50  ;;  %v240_v13 = vld [vmem:[#allocation5 + $0x3c8] sm:$0xff]  ;;  %v98_v14 = vld [vmem:[#allocation5 + $0x1c0] sm:$0xff]  ;;  %v97_v16 = vld [vmem:[#allocation5 + $0x1b8] sm:$0xff] }
  0x37   :  { %272 = vmatpush1.msra.mxu1 %v189_v51  ;;  %132 = vmatprep.subr.mxu0 %v47_v52  ;;  %v239_v15 = vld [vmem:[#allocation5 + $0x3c0] sm:$0xff]  ;;  %v238_v17 = vld [vmem:[#allocation5 + $0x3b8] sm:$0xff]  ;;  %v96_v18 = vld [vmem:[#allocation5 + $0x1b0] sm:$0xff] }
  0x38   :  { %273 = vmatprep.subr.mxu1 %v188_v53  ;;  %133 = vmatpush1.msra.mxu0 %v46_v54  ;;  %v237_v19 = vld [vmem:[#allocation5 + $0x3b0] sm:$0xff]  ;;  %v95_v20 = vld [vmem:[#allocation5 + $0x1a8] sm:$0xff]  ;;  %v94_v22 = vld [vmem:[#allocation5 + $0x1a0] sm:$0xff] }
  0x39   :  { %274 = vmatpush1.msra.mxu1 %v187_v55  ;;  %134 = vmatprep.subr.mxu0 %v45_v56  ;;  %v236_v21 = vld [vmem:[#allocation5 + $0x3a8] sm:$0xff]  ;;  %v235_v23 = vld [vmem:[#allocation5 + $0x3a0] sm:$0xff]  ;;  %v93_v24 = vld [vmem:[#allocation5 + $0x198] sm:$0xff] }
  0x3a   :  { %275 = vmatprep.subr.mxu1 %v186_v57  ;;  %135 = vmatpush1.msra.mxu0 %v44_v58  ;;  %v234_v25 = vld [vmem:[#allocation5 + $0x398] sm:$0xff]  ;;  %v92_v26 = vld [vmem:[#allocation5 + $0x190] sm:$0xff]  ;;  %v91_v28 = vld [vmem:[#allocation5 + $0x188] sm:$0xff] }
  0x3b   :  { %276 = vmatpush1.msra.mxu1 %v185_v59  ;;  %136 = vmatprep.subr.mxu0 %v43_v60  ;;  %v233_v27 = vld [vmem:[#allocation5 + $0x390] sm:$0xff]  ;;  %v232_v29 = vld [vmem:[#allocation5 + $0x388] sm:$0xff]  ;;  %v90_v30 = vld [vmem:[#allocation5 + $0x180] sm:$0xff] }
  0x3c   :  { %277 = vmatprep.subr.mxu1 %v184_v61  ;;  %137 = vmatpush1.msra.mxu0 %v42_v62  ;;  %v231_v31 = vld [vmem:[#allocation5 + $0x380] sm:$0xff]  ;;  %v89_v32 = vld [vmem:[#allocation5 + $0x178] sm:$0xff]  ;;  %v88_v34 = vld [vmem:[#allocation5 + $0x170] sm:$0xff] }
  0x3d   :  { %278 = vmatpush1.msra.mxu1 %v183_v63  ;;  %138 = vmatprep.subr.mxu0 %v105_v0  ;;  %v230_v33 = vld [vmem:[#allocation5 + $0x378] sm:$0xff]  ;;  %v229_v35 = vld [vmem:[#allocation5 + $0x370] sm:$0xff]  ;;  %v87_v36 = vld [vmem:[#allocation5 + $0x168] sm:$0xff] }
  0x3e   :  { %279 = vmatprep.subr.mxu1 %v246_v1  ;;  %139 = vmatpush2.msra.mxu0 %v104_v2  ;;  %v228_v37 = vld [vmem:[#allocation5 + $0x368] sm:$0xff]  ;;  %v86_v38 = vld [vmem:[#allocation5 + $0x160] sm:$0xff]  ;;  %v85_v40 = vld [vmem:[#allocation5 + $0x158] sm:$0xff] }
  0x3f   :  { %280 = vmatpush2.msra.mxu1 %v245_v3  ;;  %140 = vmatprep.subr.mxu0 %v103_v4  ;;  %v227_v39 = vld [vmem:[#allocation5 + $0x360] sm:$0xff]  ;;  %v226_v41 = vld [vmem:[#allocation5 + $0x358] sm:$0xff]  ;;  %v84_v42 = vld [vmem:[#allocation5 + $0x150] sm:$0xff] }
  0x40   :  { %281 = vmatprep.subr.mxu1 %v244_v5  ;;  %141 = vmatpush2.msra.mxu0 %v102_v6  ;;  %v225_v43 = vld [vmem:[#allocation5 + $0x350] sm:$0xff]  ;;  %v83_v44 = vld [vmem:[#allocation5 + $0x148] sm:$0xff]  ;;  %v82_v46 = vld [vmem:[#allocation5 + $0x140] sm:$0xff] }
  0x41   :  { %282 = vmatpush2.msra.mxu1 %v243_v7  ;;  %142 = vmatprep.subr.mxu0 %v101_v8  ;;  %v224_v45 = vld [vmem:[#allocation5 + $0x348] sm:$0xff]  ;;  %v223_v47 = vld [vmem:[#allocation5 + $0x340] sm:$0xff]  ;;  %v81_v48 = vld [vmem:[#allocation5 + $0x138] sm:$0xff] }
  0x42   :  { %283 = vmatprep.subr.mxu1 %v242_v9  ;;  %143 = vmatpush2.msra.mxu0 %v100_v10  ;;  %v222_v49 = vld [vmem:[#allocation5 + $0x338] sm:$0xff]  ;;  %v80_v50 = vld [vmem:[#allocation5 + $0x130] sm:$0xff]  ;;  %v79_v52 = vld [vmem:[#allocation5 + $0x128] sm:$0xff] }
  0x43   :  { %284 = vmatpush2.msra.mxu1 %v241_v11  ;;  %144 = vmatprep.subr.mxu0 %v99_v12  ;;  %v221_v51 = vld [vmem:[#allocation5 + $0x330] sm:$0xff]  ;;  %v220_v53 = vld [vmem:[#allocation5 + $0x328] sm:$0xff]  ;;  %v78_v54 = vld [vmem:[#allocation5 + $0x120] sm:$0xff] }
  0x44   :  { %285 = vmatprep.subr.mxu1 %v240_v13  ;;  %145 = vmatpush2.msra.mxu0 %v98_v14  ;;  %v219_v55 = vld [vmem:[#allocation5 + $0x320] sm:$0xff]  ;;  %v77_v56 = vld [vmem:[#allocation5 + $0x118] sm:$0xff]  ;;  %v76_v58 = vld [vmem:[#allocation5 + $0x110] sm:$0xff] }
  0x45   :  { %286 = vmatpush2.msra.mxu1 %v239_v15  ;;  %146 = vmatprep.subr.mxu0 %v97_v16  ;;  %v218_v57 = vld [vmem:[#allocation5 + $0x318] sm:$0xff]  ;;  %v217_v59 = vld [vmem:[#allocation5 + $0x310] sm:$0xff]  ;;  %v75_v60 = vld [vmem:[#allocation5 + $0x108] sm:$0xff] }
  0x46   :  { %287 = vmatprep.subr.mxu1 %v238_v17  ;;  %147 = vmatpush2.msra.mxu0 %v96_v18  ;;  %v216_v61 = vld [vmem:[#allocation5 + $0x308] sm:$0xff]  ;;  %v74_v62 = vld [vmem:[#allocation5 + $0x100] sm:$0xff]  ;;  %v181_v1 = vld [vmem:[#allocation2 + $0x18] sm:$0xff] }
  0x47   :  { %288 = vmatpush2.msra.mxu1 %v237_v19  ;;  %148 = vmatprep.subr.mxu0 %v95_v20  ;;  %v41_v63 = vld [vmem:[#allocation2 + $0x8] sm:$0xff]  ;;  %v215_v0 = vld [vmem:[#allocation5 + $0x300] sm:$0xff]  ;;  %v180_v3 = vld [vmem:[#allocation2 + $0x10] sm:$0xff] }
  0x48   :  { %289 = vmatprep.subr.mxu1 %v236_v21  ;;  %149 = vmatpush2.msra.mxu0 %v94_v22  ;;  %v40_v2 = vld [vmem:[#allocation2] sm:$0xff]  ;;  %v356_v4 = vld [vmem:[#allocation5 + $0x4f8] sm:$0xff]  ;;  %v355_v6 = vld [vmem:[#allocation5 + $0x4f0] sm:$0xff] }
  0x49   :  { %290 = vmatpush2.msra.mxu1 %v235_v23  ;;  %150 = vmatprep.subr.mxu0 %v93_v24  ;;  %v498_v5 = vld [vmem:[#allocation5 + $0x6f8] sm:$0xff]  ;;  %v497_v7 = vld [vmem:[#allocation5 + $0x6f0] sm:$0xff]  ;;  %v354_v8 = vld [vmem:[#allocation5 + $0x4e8] sm:$0xff] }
  0x4a   :  { %291 = vmatprep.subr.mxu1 %v234_v25  ;;  %151 = vmatpush2.msra.mxu0 %v92_v26  ;;  %v496_v9 = vld [vmem:[#allocation5 + $0x6e8] sm:$0xff]  ;;  %v353_v10 = vld [vmem:[#allocation5 + $0x4e0] sm:$0xff]  ;;  %v352_v12 = vld [vmem:[#allocation5 + $0x4d8] sm:$0xff] }
  0x4b   :  { %292 = vmatpush2.msra.mxu1 %v233_v27  ;;  %152 = vmatprep.subr.mxu0 %v91_v28  ;;  %v495_v11 = vld [vmem:[#allocation5 + $0x6e0] sm:$0xff]  ;;  %v494_v13 = vld [vmem:[#allocation5 + $0x6d8] sm:$0xff]  ;;  %v351_v14 = vld [vmem:[#allocation5 + $0x4d0] sm:$0xff] }
  0x4c   :  { %293 = vmatprep.subr.mxu1 %v232_v29  ;;  %153 = vmatpush2.msra.mxu0 %v90_v30  ;;  %v493_v15 = vld [vmem:[#allocation5 + $0x6d0] sm:$0xff]  ;;  %v350_v16 = vld [vmem:[#allocation5 + $0x4c8] sm:$0xff]  ;;  %v349_v18 = vld [vmem:[#allocation5 + $0x4c0] sm:$0xff] }
  0x4d   :  { %294 = vmatpush2.msra.mxu1 %v231_v31  ;;  %154 = vmatprep.subr.mxu0 %v89_v32  ;;  %v492_v17 = vld [vmem:[#allocation5 + $0x6c8] sm:$0xff]  ;;  %v491_v19 = vld [vmem:[#allocation5 + $0x6c0] sm:$0xff]  ;;  %v348_v20 = vld [vmem:[#allocation5 + $0x4b8] sm:$0xff] }
  0x4e   :  { %295 = vmatprep.subr.mxu1 %v230_v33  ;;  %155 = vmatpush2.msra.mxu0 %v88_v34  ;;  %v490_v21 = vld [vmem:[#allocation5 + $0x6b8] sm:$0xff]  ;;  %v347_v22 = vld [vmem:[#allocation5 + $0x4b0] sm:$0xff]  ;;  %v346_v24 = vld [vmem:[#allocation5 + $0x4a8] sm:$0xff] }
  0x4f   :  { %296 = vmatpush2.msra.mxu1 %v229_v35  ;;  %156 = vmatprep.subr.mxu0 %v87_v36  ;;  %v489_v23 = vld [vmem:[#allocation5 + $0x6b0] sm:$0xff]  ;;  %v488_v25 = vld [vmem:[#allocation5 + $0x6a8] sm:$0xff]  ;;  %v345_v26 = vld [vmem:[#allocation5 + $0x4a0] sm:$0xff] }
  0x50   :  { %297 = vmatprep.subr.mxu1 %v228_v37  ;;  %157 = vmatpush2.msra.mxu0 %v86_v38  ;;  %v487_v27 = vld [vmem:[#allocation5 + $0x6a0] sm:$0xff]  ;;  %v344_v28 = vld [vmem:[#allocation5 + $0x498] sm:$0xff]  ;;  %v343_v30 = vld [vmem:[#allocation5 + $0x490] sm:$0xff] }
  0x51   :  { %298 = vmatpush2.msra.mxu1 %v227_v39  ;;  %158 = vmatprep.subr.mxu0 %v85_v40  ;;  %v486_v29 = vld [vmem:[#allocation5 + $0x698] sm:$0xff]  ;;  %v485_v31 = vld [vmem:[#allocation5 + $0x690] sm:$0xff]  ;;  %v342_v32 = vld [vmem:[#allocation5 + $0x488] sm:$0xff] }
  0x52   :  { %299 = vmatprep.subr.mxu1 %v226_v41  ;;  %159 = vmatpush2.msra.mxu0 %v84_v42  ;;  %v484_v33 = vld [vmem:[#allocation5 + $0x688] sm:$0xff]  ;;  %v341_v34 = vld [vmem:[#allocation5 + $0x480] sm:$0xff]  ;;  %v340_v36 = vld [vmem:[#allocation5 + $0x478] sm:$0xff] }
  0x53   :  { %300 = vmatpush2.msra.mxu1 %v225_v43  ;;  %160 = vmatprep.subr.mxu0 %v83_v44  ;;  %v483_v35 = vld [vmem:[#allocation5 + $0x680] sm:$0xff]  ;;  %v482_v37 = vld [vmem:[#allocation5 + $0x678] sm:$0xff]  ;;  %v339_v38 = vld [vmem:[#allocation5 + $0x470] sm:$0xff] }
  0x54   :  { %301 = vmatprep.subr.mxu1 %v224_v45  ;;  %161 = vmatpush2.msra.mxu0 %v82_v46  ;;  %v481_v39 = vld [vmem:[#allocation5 + $0x670] sm:$0xff]  ;;  %v338_v40 = vld [vmem:[#allocation5 + $0x468] sm:$0xff]  ;;  %v337_v42 = vld [vmem:[#allocation5 + $0x460] sm:$0xff] }
  0x55   :  { %302 = vmatpush2.msra.mxu1 %v223_v47  ;;  %162 = vmatprep.subr.mxu0 %v81_v48  ;;  %v480_v41 = vld [vmem:[#allocation5 + $0x668] sm:$0xff]  ;;  %v479_v43 = vld [vmem:[#allocation5 + $0x660] sm:$0xff]  ;;  %v336_v44 = vld [vmem:[#allocation5 + $0x458] sm:$0xff] }
  0x56   :  { %303 = vmatprep.subr.mxu1 %v222_v49  ;;  %163 = vmatpush2.msra.mxu0 %v80_v50  ;;  %v478_v45 = vld [vmem:[#allocation5 + $0x658] sm:$0xff]  ;;  %v335_v46 = vld [vmem:[#allocation5 + $0x450] sm:$0xff]  ;;  %v334_v48 = vld [vmem:[#allocation5 + $0x448] sm:$0xff] }
  0x57   :  { %304 = vmatpush2.msra.mxu1 %v221_v51  ;;  %164 = vmatprep.subr.mxu0 %v79_v52  ;;  %v477_v47 = vld [vmem:[#allocation5 + $0x650] sm:$0xff]  ;;  %v476_v49 = vld [vmem:[#allocation5 + $0x648] sm:$0xff]  ;;  %v333_v50 = vld [vmem:[#allocation5 + $0x440] sm:$0xff] }
  0x58   :  { %305 = vmatprep.subr.mxu1 %v220_v53  ;;  %165 = vmatpush2.msra.mxu0 %v78_v54  ;;  %v475_v51 = vld [vmem:[#allocation5 + $0x640] sm:$0xff]  ;;  %v332_v52 = vld [vmem:[#allocation5 + $0x438] sm:$0xff]  ;;  %v331_v54 = vld [vmem:[#allocation5 + $0x430] sm:$0xff] }
  0x59   :  { %306 = vmatpush2.msra.mxu1 %v219_v55  ;;  %166 = vmatprep.subr.mxu0 %v77_v56  ;;  %v474_v53 = vld [vmem:[#allocation5 + $0x638] sm:$0xff]  ;;  %v473_v55 = vld [vmem:[#allocation5 + $0x630] sm:$0xff]  ;;  %v330_v56 = vld [vmem:[#allocation5 + $0x428] sm:$0xff] }
  0x5a   :  { %307 = vmatprep.subr.mxu1 %v218_v57  ;;  %167 = vmatpush2.msra.mxu0 %v76_v58  ;;  %v472_v57 = vld [vmem:[#allocation5 + $0x628] sm:$0xff]  ;;  %v329_v58 = vld [vmem:[#allocation5 + $0x420] sm:$0xff] }
  0x5b   :  { %308 = vmatpush2.msra.mxu1 %v217_v59  ;;  %168 = vmatprep.subr.mxu0 %v75_v60  ;;  %v471_v59 = vld [vmem:[#allocation5 + $0x620] sm:$0xff]  ;;  %v328_v60 = vld [vmem:[#allocation5 + $0x418] sm:$0xff] }
  0x5c   :  { %309 = vmatprep.subr.mxu1 %v216_v61  ;;  %169 = vmatpush2.msra.mxu0 %v74_v62  ;;  %v470_v61 = vld [vmem:[#allocation5 + $0x618] sm:$0xff]  ;;  %v327_v62 = vld [vmem:[#allocation5 + $0x410] sm:$0xff] }
  0x5d   :  { %170 = vmatprep.mubr.f32.mxu0 %v41_v63  ;;  %310 = vmatpush2.msra.mxu1 %v215_v0  ;;  %v469_v63 = vld [vmem:[#allocation5 + $0x610] sm:$0xff]  ;;  %v326_v0 = vld [vmem:[#allocation5 + $0x408] sm:$0xff] }
  0x5e   :  { %311 = vmatprep.mubr.f32.mxu1 %v181_v1  ;;  %171 = vmatmul.mubr.f32.vlgmr.msra.gmra.mxu0 %v40_v2  ;;  %v468_v1 = vld [vmem:[#allocation5 + $0x608] sm:$0xff]  ;;  %v325_v2 = vld [vmem:[#allocation5 + $0x400] sm:$0xff] }
  0x5f   :  { %312 = vmatmul.mubr.f32.vlgmr.msra.gmra.mxu1 %v180_v3  ;;  %389 = vmatprep.subr.mxu0 %v356_v4  ;;  %v467_v3 = vld [vmem:[#allocation5 + $0x600] sm:$0xff]  ;;  %v388_v4 = vld [vmem:[#allocation5 + $0x5f8] sm:$0xff] }
  0x60   :  { %531 = vmatprep.subr.mxu1 %v498_v5  ;;  %390 = vmatpush1.msra.mxu0 %v355_v6  ;;  %v530_v5 = vld [vmem:[#allocation5 + $0x7f8] sm:$0xff]  ;;  %v387_v6 = vld [vmem:[#allocation5 + $0x5f0] sm:$0xff] }
  0x61   :  { %532 = vmatpush1.msra.mxu1 %v497_v7  ;;  %391 = vmatprep.subr.mxu0 %v354_v8  ;;  %v529_v7 = vld [vmem:[#allocation5 + $0x7f0] sm:$0xff]  ;;  %v386_v8 = vld [vmem:[#allocation5 + $0x5e8] sm:$0xff] }
  0x62   :  { %533 = vmatprep.subr.mxu1 %v496_v9  ;;  %392 = vmatpush1.msra.mxu0 %v353_v10  ;;  %v528_v9 = vld [vmem:[#allocation5 + $0x7e8] sm:$0xff]  ;;  %v385_v10 = vld [vmem:[#allocation5 + $0x5e0] sm:$0xff] }
  0x63   :  { %534 = vmatpush1.msra.mxu1 %v495_v11  ;;  %393 = vmatprep.subr.mxu0 %v352_v12  ;;  %v527_v11 = vld [vmem:[#allocation5 + $0x7e0] sm:$0xff]  ;;  %v384_v12 = vld [vmem:[#allocation5 + $0x5d8] sm:$0xff] }
  0x64   :  { %535 = vmatprep.subr.mxu1 %v494_v13  ;;  %394 = vmatpush1.msra.mxu0 %v351_v14  ;;  %v526_v13 = vld [vmem:[#allocation5 + $0x7d8] sm:$0xff]  ;;  %v383_v14 = vld [vmem:[#allocation5 + $0x5d0] sm:$0xff] }
  0x65   :  { %536 = vmatpush1.msra.mxu1 %v493_v15  ;;  %395 = vmatprep.subr.mxu0 %v350_v16  ;;  %v525_v15 = vld [vmem:[#allocation5 + $0x7d0] sm:$0xff]  ;;  %v382_v16 = vld [vmem:[#allocation5 + $0x5c8] sm:$0xff] }
  0x66   :  { %537 = vmatprep.subr.mxu1 %v492_v17  ;;  %396 = vmatpush1.msra.mxu0 %v349_v18  ;;  %v524_v17 = vld [vmem:[#allocation5 + $0x7c8] sm:$0xff]  ;;  %v381_v18 = vld [vmem:[#allocation5 + $0x5c0] sm:$0xff] }
  0x67   :  { %538 = vmatpush1.msra.mxu1 %v491_v19  ;;  %397 = vmatprep.subr.mxu0 %v348_v20  ;;  %v523_v19 = vld [vmem:[#allocation5 + $0x7c0] sm:$0xff]  ;;  %v380_v20 = vld [vmem:[#allocation5 + $0x5b8] sm:$0xff] }
  0x68   :  { %539 = vmatprep.subr.mxu1 %v490_v21  ;;  %398 = vmatpush1.msra.mxu0 %v347_v22  ;;  %v522_v21 = vld [vmem:[#allocation5 + $0x7b8] sm:$0xff]  ;;  %v379_v22 = vld [vmem:[#allocation5 + $0x5b0] sm:$0xff] }
  0x69   :  { %540 = vmatpush1.msra.mxu1 %v489_v23  ;;  %399 = vmatprep.subr.mxu0 %v346_v24  ;;  %v521_v23 = vld [vmem:[#allocation5 + $0x7b0] sm:$0xff]  ;;  %v378_v24 = vld [vmem:[#allocation5 + $0x5a8] sm:$0xff] }
  0x6a   :  { %541 = vmatprep.subr.mxu1 %v488_v25  ;;  %400 = vmatpush1.msra.mxu0 %v345_v26  ;;  %v520_v25 = vld [vmem:[#allocation5 + $0x7a8] sm:$0xff]  ;;  %v377_v26 = vld [vmem:[#allocation5 + $0x5a0] sm:$0xff] }
  0x6b   :  { %542 = vmatpush1.msra.mxu1 %v487_v27  ;;  %401 = vmatprep.subr.mxu0 %v344_v28  ;;  %v519_v27 = vld [vmem:[#allocation5 + $0x7a0] sm:$0xff]  ;;  %v376_v28 = vld [vmem:[#allocation5 + $0x598] sm:$0xff] }
  0x6c   :  { %543 = vmatprep.subr.mxu1 %v486_v29  ;;  %402 = vmatpush1.msra.mxu0 %v343_v30  ;;  %v518_v29 = vld [vmem:[#allocation5 + $0x798] sm:$0xff]  ;;  %v375_v30 = vld [vmem:[#allocation5 + $0x590] sm:$0xff] }
  0x6d   :  { %544 = vmatpush1.msra.mxu1 %v485_v31  ;;  %403 = vmatprep.subr.mxu0 %v342_v32  ;;  %v517_v31 = vld [vmem:[#allocation5 + $0x790] sm:$0xff]  ;;  %v374_v32 = vld [vmem:[#allocation5 + $0x588] sm:$0xff] }
  0x6e   :  { %545 = vmatprep.subr.mxu1 %v484_v33  ;;  %404 = vmatpush1.msra.mxu0 %v341_v34  ;;  %v516_v33 = vld [vmem:[#allocation5 + $0x788] sm:$0xff]  ;;  %v373_v34 = vld [vmem:[#allocation5 + $0x580] sm:$0xff] }
  0x6f   :  { %546 = vmatpush1.msra.mxu1 %v483_v35  ;;  %405 = vmatprep.subr.mxu0 %v340_v36  ;;  %v515_v35 = vld [vmem:[#allocation5 + $0x780] sm:$0xff]  ;;  %v372_v36 = vld [vmem:[#allocation5 + $0x578] sm:$0xff] }
  0x70   :  { %547 = vmatprep.subr.mxu1 %v482_v37  ;;  %406 = vmatpush1.msra.mxu0 %v339_v38  ;;  %v514_v37 = vld [vmem:[#allocation5 + $0x778] sm:$0xff]  ;;  %v371_v38 = vld [vmem:[#allocation5 + $0x570] sm:$0xff] }
  0x71   :  { %548 = vmatpush1.msra.mxu1 %v481_v39  ;;  %407 = vmatprep.subr.mxu0 %v338_v40  ;;  %v513_v39 = vld [vmem:[#allocation5 + $0x770] sm:$0xff]  ;;  %v370_v40 = vld [vmem:[#allocation5 + $0x568] sm:$0xff] }
  0x72   :  { %549 = vmatprep.subr.mxu1 %v480_v41  ;;  %408 = vmatpush1.msra.mxu0 %v337_v42  ;;  %v512_v41 = vld [vmem:[#allocation5 + $0x768] sm:$0xff]  ;;  %v369_v42 = vld [vmem:[#allocation5 + $0x560] sm:$0xff] }
  0x73   :  { %550 = vmatpush1.msra.mxu1 %v479_v43  ;;  %409 = vmatprep.subr.mxu0 %v336_v44  ;;  %v511_v43 = vld [vmem:[#allocation5 + $0x760] sm:$0xff]  ;;  %v368_v44 = vld [vmem:[#allocation5 + $0x558] sm:$0xff] }
  0x74   :  { %551 = vmatprep.subr.mxu1 %v478_v45  ;;  %410 = vmatpush1.msra.mxu0 %v335_v46  ;;  %v510_v45 = vld [vmem:[#allocation5 + $0x758] sm:$0xff]  ;;  %v367_v46 = vld [vmem:[#allocation5 + $0x550] sm:$0xff] }
  0x75   :  { %552 = vmatpush1.msra.mxu1 %v477_v47  ;;  %411 = vmatprep.subr.mxu0 %v334_v48  ;;  %v509_v47 = vld [vmem:[#allocation5 + $0x750] sm:$0xff]  ;;  %v366_v48 = vld [vmem:[#allocation5 + $0x548] sm:$0xff] }
  0x76   :  { %553 = vmatprep.subr.mxu1 %v476_v49  ;;  %412 = vmatpush1.msra.mxu0 %v333_v50  ;;  %v508_v49 = vld [vmem:[#allocation5 + $0x748] sm:$0xff]  ;;  %v365_v50 = vld [vmem:[#allocation5 + $0x540] sm:$0xff] }
  0x77   :  { %554 = vmatpush1.msra.mxu1 %v475_v51  ;;  %413 = vmatprep.subr.mxu0 %v332_v52  ;;  %v507_v51 = vld [vmem:[#allocation5 + $0x740] sm:$0xff]  ;;  %v364_v52 = vld [vmem:[#allocation5 + $0x538] sm:$0xff] }
  0x78   :  { %555 = vmatprep.subr.mxu1 %v474_v53  ;;  %414 = vmatpush1.msra.mxu0 %v331_v54  ;;  %v506_v53 = vld [vmem:[#allocation5 + $0x738] sm:$0xff]  ;;  %v363_v54 = vld [vmem:[#allocation5 + $0x530] sm:$0xff] }
  0x79   :  { %556 = vmatpush1.msra.mxu1 %v473_v55  ;;  %415 = vmatprep.subr.mxu0 %v330_v56  ;;  %v505_v55 = vld [vmem:[#allocation5 + $0x730] sm:$0xff]  ;;  %v362_v56 = vld [vmem:[#allocation5 + $0x528] sm:$0xff] }
  0x7a   :  { %557 = vmatprep.subr.mxu1 %v472_v57  ;;  %416 = vmatpush1.msra.mxu0 %v329_v58  ;;  %v504_v57 = vld [vmem:[#allocation5 + $0x728] sm:$0xff]  ;;  %v361_v58 = vld [vmem:[#allocation5 + $0x520] sm:$0xff] }
  0x7b   :  { %558 = vmatpush1.msra.mxu1 %v471_v59  ;;  %417 = vmatprep.subr.mxu0 %v328_v60  ;;  %v503_v59 = vld [vmem:[#allocation5 + $0x720] sm:$0xff]  ;;  %v360_v60 = vld [vmem:[#allocation5 + $0x518] sm:$0xff] }
  0x7c   :  { %559 = vmatprep.subr.mxu1 %v470_v61  ;;  %418 = vmatpush1.msra.mxu0 %v327_v62  ;;  %v502_v61 = vld [vmem:[#allocation5 + $0x718] sm:$0xff]  ;;  %v359_v62 = vld [vmem:[#allocation5 + $0x510] sm:$0xff] }
  0x7d   :  { %560 = vmatpush1.msra.mxu1 %v469_v63  ;;  %419 = vmatprep.subr.mxu0 %v326_v0  ;;  %v501_v63 = vld [vmem:[#allocation5 + $0x710] sm:$0xff]  ;;  %v358_v0 = vld [vmem:[#allocation5 + $0x508] sm:$0xff] }
  0x7e   :  { %561 = vmatprep.subr.mxu1 %v468_v1  ;;  %420 = vmatpush1.msra.mxu0 %v325_v2  ;;  %v500_v1 = vld [vmem:[#allocation5 + $0x708] sm:$0xff]  ;;  %v357_v2 = vld [vmem:[#allocation5 + $0x500] sm:$0xff] }
  0x7f   :  { %562 = vmatpush1.msra.mxu1 %v467_v3  ;;  %421 = vmatprep.subr.mxu0 %v388_v4  ;;  %v323_v3 = vld [vmem:[#allocation2 + $0x28] sm:$0xff]  ;;  %v499_v4 = vld [vmem:[#allocation5 + $0x700] sm:$0xff] }
  0x80   :  { %563 = vmatprep.subr.mxu1 %v530_v5  ;;  %422 = vmatpush2.msra.mxu0 %v387_v6  ;;  %v465_v5 = vld [vmem:[#allocation2 + $0x38] sm:$0xff]  ;;  %v322_v6 = vld [vmem:[#allocation2 + $0x20] sm:$0xff] }
  0x81   :  { %564 = vmatpush2.msra.mxu1 %v529_v7  ;;  %423 = vmatprep.subr.mxu0 %v386_v8  ;;  %v464_v7 = vld [vmem:[#allocation2 + $0x30] sm:$0xff] }
  0x82   :  { %565 = vmatprep.subr.mxu1 %v528_v9  ;;  %424 = vmatpush2.msra.mxu0 %v385_v10 }
  0x83   :  { %566 = vmatpush2.msra.mxu1 %v527_v11  ;;  %425 = vmatprep.subr.mxu0 %v384_v12 }
  0x84   :  { %567 = vmatprep.subr.mxu1 %v526_v13  ;;  %426 = vmatpush2.msra.mxu0 %v383_v14 }
  0x85   :  { %568 = vmatpush2.msra.mxu1 %v525_v15  ;;  %427 = vmatprep.subr.mxu0 %v382_v16 }
  0x86   :  { %569 = vmatprep.subr.mxu1 %v524_v17  ;;  %428 = vmatpush2.msra.mxu0 %v381_v18 }
  0x87   :  { %570 = vmatpush2.msra.mxu1 %v523_v19  ;;  %429 = vmatprep.subr.mxu0 %v380_v20 }
  0x88   :  { %571 = vmatprep.subr.mxu1 %v522_v21  ;;  %430 = vmatpush2.msra.mxu0 %v379_v22 }
  0x89   :  { %572 = vmatpush2.msra.mxu1 %v521_v23  ;;  %431 = vmatprep.subr.mxu0 %v378_v24 }
  0x8a   :  { %573 = vmatprep.subr.mxu1 %v520_v25  ;;  %432 = vmatpush2.msra.mxu0 %v377_v26 }
  0x8b   :  { %574 = vmatpush2.msra.mxu1 %v519_v27  ;;  %433 = vmatprep.subr.mxu0 %v376_v28 }
  0x8c   :  { %575 = vmatprep.subr.mxu1 %v518_v29  ;;  %434 = vmatpush2.msra.mxu0 %v375_v30 }
  0x8d   :  { %576 = vmatpush2.msra.mxu1 %v517_v31  ;;  %435 = vmatprep.subr.mxu0 %v374_v32 }
  0x8e   :  { %577 = vmatprep.subr.mxu1 %v516_v33  ;;  %436 = vmatpush2.msra.mxu0 %v373_v34 }
  0x8f   :  { %578 = vmatpush2.msra.mxu1 %v515_v35  ;;  %437 = vmatprep.subr.mxu0 %v372_v36 }
  0x90   :  { %579 = vmatprep.subr.mxu1 %v514_v37  ;;  %438 = vmatpush2.msra.mxu0 %v371_v38 }
  0x91   :  { %580 = vmatpush2.msra.mxu1 %v513_v39  ;;  %439 = vmatprep.subr.mxu0 %v370_v40 }
  0x92   :  { %581 = vmatprep.subr.mxu1 %v512_v41  ;;  %440 = vmatpush2.msra.mxu0 %v369_v42 }
  0x93   :  { %582 = vmatpush2.msra.mxu1 %v511_v43  ;;  %441 = vmatprep.subr.mxu0 %v368_v44 }
  0x94   :  { %583 = vmatprep.subr.mxu1 %v510_v45  ;;  %442 = vmatpush2.msra.mxu0 %v367_v46 }
  0x95   :  { %584 = vmatpush2.msra.mxu1 %v509_v47  ;;  %443 = vmatprep.subr.mxu0 %v366_v48 }
  0x96   :  { %585 = vmatprep.subr.mxu1 %v508_v49  ;;  %444 = vmatpush2.msra.mxu0 %v365_v50 }
  0x97   :  { %586 = vmatpush2.msra.mxu1 %v507_v51  ;;  %445 = vmatprep.subr.mxu0 %v364_v52 }
  0x98   :  { %587 = vmatprep.subr.mxu1 %v506_v53  ;;  %446 = vmatpush2.msra.mxu0 %v363_v54 }
  0x99   :  { %588 = vmatpush2.msra.mxu1 %v505_v55  ;;  %447 = vmatprep.subr.mxu0 %v362_v56 }
  0x9a   :  { %589 = vmatprep.subr.mxu1 %v504_v57  ;;  %448 = vmatpush2.msra.mxu0 %v361_v58 }
  0x9b   :  { %590 = vmatpush2.msra.mxu1 %v503_v59  ;;  %449 = vmatprep.subr.mxu0 %v360_v60 }
  0x9c   :  { %591 = vmatprep.subr.mxu1 %v502_v61  ;;  %450 = vmatpush2.msra.mxu0 %v359_v62 }
  0x9d   :  { %592 = vmatpush2.msra.mxu1 %v501_v63  ;;  %451 = vmatprep.subr.mxu0 %v358_v0 }
  0x9e   :  { %593 = vmatprep.subr.mxu1 %v500_v1  ;;  %452 = vmatpush2.msra.mxu0 %v357_v2 }
  0x9f   :  { %453 = vmatprep.mubr.f32.mxu0 %v323_v3  ;;  %594 = vmatpush2.msra.mxu1 %v499_v4 }
  0xa0   :  { %595 = vmatprep.mubr.f32.mxu1 %v465_v5  ;;  %454 = vmatmul.mubr.f32.vlgmr.msra.gmra.mxu0 %v322_v6 }
  0xa1   :  { %596 = vmatmul.mubr.f32.vlgmr.msra.gmra.mxu1 %v464_v7 }
 0x11e   :  { %v172_v8 = vpop.f32.mrf.mxu0 }
 0x11f   :  { %v313_v9 = vpop.f32.mrf.mxu1  ;;  %177 = vst [vmem:[#allocation7] sm:$0xff] %v172_v8 }
 0x120   :  { %319 = vst [vmem:[#allocation7 + $0x10] sm:$0xff] %v313_v9  ;;  %v174_v10 = vpop.f32.mrf.mxu0 }
 0x121   :  { %v315_v11 = vpop.f32.mrf.mxu1  ;;  %178 = vst [vmem:[#allocation7 + $0x8] sm:$0xff] %v174_v10 }
 0x122   :  { %320 = vst [vmem:[#allocation7 + $0x18] sm:$0xff] %v315_v11 }
 0x160   :  { %v455_v12 = vpop.f32.mrf.mxu0 }
 0x161   :  { %v597_v13 = vpop.f32.mrf.mxu1  ;;  %461 = vst [vmem:[#allocation7 + $0x20] sm:$0xff] %v455_v12 }
 0x162   :  { %603 = vst [vmem:[#allocation7 + $0x30] sm:$0xff] %v597_v13  ;;  %v457_v14 = vpop.f32.mrf.mxu0 }
 0x163   :  { %v599_v15 = vpop.f32.mrf.mxu1  ;;  %462 = vst [vmem:[#allocation7 + $0x28] sm:$0xff] %v457_v14 }
 0x164   :  { %604 = vst [vmem:[#allocation7 + $0x38] sm:$0xff] %v599_v15 }
 0x165   :  { %679 = shalt.err (!%p676_p0)
}
 0x166   :  { %616 = dma.vmem_to_hbm [thread:$0]  %s611_s1, 1024, %s734_s2, [#allocation4], %s695_s12, %s695_s12, %s696_s13  }
 0x167   :  { %692 = dma.done.wait [#allocation4], 1024  }
 0x168   :  { %693 = vsyncadd [#allocation4], 4294966272 }
 0x169   :  { %620 = vsyncpa [#allocation3], 1 }
 0x16a   :  { %621 = vsyncpa [#allocation6], 1 }
 0x16b   :  { %622 = vsyncpa [#allocation4], 1 }

</bundles_post_ra>
